<compile_context>
chip_gen: v7x
topology: tpu7x:2x2x1
jax: 0.10.0
libtpu: 0.0.40
codegen_flags: <defaults>
</compile_context>

<pallas_src>
import functools

import jax
import jax.numpy as jnp
from jax.experimental import pallas as pl
from jax.experimental.pallas import tpu as pltpu


def _round_up(x, m):
    return ((x + m - 1) // m) * m


def _vmem_capacity_bytes():
    """Per-TensorCore VMEM capacity; conservative fallback if query fails."""
    try:
        return int(pltpu.get_tpu_info().vmem_capacity_bytes)
    except Exception:
        return 64 << 20  # v7x per-TC size: safe lower bound for all gens


def feature_correlation_kernel(a_ref, b_ref, o_ref, *, normalization):
    # a_ref: (Mp, Cp), b_ref: (TN, Cp), o_ref: (Mp, TN)  (batch dim squeezed)
    a = a_ref[...]
    b = b_ref[...]
    # Contract over channels (last dim of both) -> (Mp, TN); no explicit
    # transpose, Mosaic folds it into the MXU RHS load path.
    corr = jax.lax.dot_general(
        a, b,
        dimension_numbers=(((1,), (1,)), ((), ())),
        preferred_element_type=jnp.float32,
    )
    if normalization:
        corr = jnp.maximum(corr, 0.0)                       # ReLU
        # featureL2Norm over dim=1 of (B, M, N) -> axis 0 of this (Mp, TN)
        # tile.  M is whole (padded rows are zero), so the norm is exact.
        sq = jnp.sum(corr * corr, axis=0, keepdims=True) + 1e-6
        corr = corr * jax.lax.rsqrt(sq)                     # 1 EUP + 1 vmul
    o_ref[...] = corr.astype(o_ref.dtype)


def feature_correlation(feature_A, feature_B, mask_A=None, mask_B=None,
                        normalization=True, compute_in_bf16=False,
                        out_dtype=jnp.float32):
    """Pallas implementation of FeatureCorrelation.forward."""
    B, M, C = feature_A.shape
    Bb, N, Cb = feature_B.shape
    assert B == Bb and C == Cb, "batch / channel dims must match"

    # ---- wrapper-side dtype + padding (lane/sublane-dense, math-neutral) ----
    in_dtype = jnp.bfloat16 if compute_in_bf16 else feature_A.dtype
    Cp = _round_up(C, 128)   # lane dim of inputs / K dim of MXU
    Np = _round_up(N, 128)   # lane dim of output
    Mp = _round_up(M, 8)     # sublane dim of A / output

    fa = feature_A.astype(in_dtype)
    fb = feature_B.astype(in_dtype)
    if (Mp, Cp) != (M, C):
        fa = jnp.pad(fa, ((0, 0), (0, Mp - M), (0, Cp - C)))
    if (Np, Cp) != (N, C):
        fb = jnp.pad(fb, ((0, 0), (0, Np - N), (0, Cp - C)))

    in_bytes = jnp.dtype(in_dtype).itemsize
    out_bytes = jnp.dtype(out_dtype).itemsize

    # ---- generation-aware tile selection + VMEM budget ----
    cap = _vmem_capacity_bytes()
    budget = int(0.8 * cap)

    candidates = [t for t in (2048, 1024, 512, 256, 128) if Np % t == 0]

    def _need(tn):
        # A slab (double-buffered, revisited across N), B tile x2, out tile x2.
        return 2 * (Mp * Cp * in_bytes + tn * Cp * in_bytes + Mp * tn * out_bytes)

    tn = candidates[-1]            # 128 always divides padded N
    vmem_need = _need(tn)
    for cand in candidates:
        if _need(cand) <= budget:
            tn, vmem_need = cand, _need(cand)
            break
    # TODO(synk): two-pass M-tiled variant (partial sum-of-squares + broadcast
    # rsqrt pass) for very large M*C that exceeds v7x's 64 MiB even at TN=128.

    n_tiles = Np // tn
    vmem_limit = min(max(vmem_need + (8 << 20), 32 << 20), cap)

    cost = pl.CostEstimate(
        flops=2 * B * Mp * Np * Cp,
        transcendentals=B * Np if normalization else 0,
        # A is DMA'd once per batch (block index constant across the N axis).
        bytes_accessed=B * (Mp * Cp * in_bytes + Np * Cp * in_bytes
                            + Mp * Np * out_bytes),
    )

    kernel = functools.partial(feature_correlation_kernel,
                               normalization=normalization)

    out = pl.pallas_call(
        kernel,
        out_shape=jax.ShapeDtypeStruct((B, Mp, Np), out_dtype),
        grid_spec=pltpu.PrefetchScalarGridSpec(
            num_scalar_prefetch=0,
            grid=(B, n_tiles),
            in_specs=[
                # A slab held resident across the N axis (same block index).
                pl.BlockSpec((pl.Squeezed(), Mp, Cp), lambda b, n: (b, 0, 0)),
                # B tile walks the N axis.
                pl.BlockSpec((pl.Squeezed(), tn, Cp), lambda b, n: (b, n, 0)),
            ],
            # FIXED index map: full-M block is index 0, N-tile index last.
            out_specs=pl.BlockSpec((pl.Squeezed(), Mp, tn),
                                   lambda b, n: (b, 0, n)),
        ),
        compiler_params=pltpu.CompilerParams(
            dimension_semantics=("parallel", "parallel"),
            vmem_limit_bytes=int(vmem_limit),
        ),
        cost_estimate=cost,
    )(fa, fb)

    if (Mp, Np) != (M, N):
        out = out[:, :M, :N]
    return out


def feature_correlation_ref(feature_A, feature_B, normalization=True):
    """Pure-JAX reference (mirrors the PyTorch forward)."""
    corr = jnp.einsum("bmc,bnc->bmn", feature_A, feature_B)
    if normalization:
        corr = jnp.maximum(corr, 0.0)
        norm = jnp.sqrt(jnp.sum(corr * corr, axis=1, keepdims=True) + 1e-6)
        corr = corr / norm
    return corr


if __name__ == "__main__":
    key = jax.random.PRNGKey(0)
    kA, kB = jax.random.split(key)

    # Case 1: batch=2, spatial 8x8 -> M=N=64, channels=32 (module-scale shapes).
    B, M, N, C = 2, 64, 64, 32
    feature_A = jax.random.normal(kA, (B, M, C), dtype=jnp.float32)
    feature_B = jax.random.normal(kB, (B, N, C), dtype=jnp.float32)
    mask_A = jnp.ones((B, M), dtype=jnp.float32)   # unused, as in the reference
    mask_B = jnp.ones((B, N), dtype=jnp.float32)   # unused, as in the reference

    out = jax.block_until_ready(
        feature_correlation(feature_A, feature_B, mask_A, mask_B,
                            normalization=True))
    ref = feature_correlation_ref(feature_A, feature_B, normalization=True)
    assert out.shape == (B, M, N)
    assert jnp.allclose(out, ref, atol=1e-5, rtol=1e-5), "mismatch vs reference"

    # normalization=False path (plain bmm).
    out_nn = jax.block_until_ready(
        feature_correlation(feature_A, feature_B, mask_A, mask_B,
                            normalization=False))
    ref_nn = feature_correlation_ref(feature_A, feature_B, normalization=False)
    assert jnp.allclose(out_nn, ref_nn, atol=1e-5, rtol=1e-5), "bmm mismatch"

    # Case 2: irregular dims — exercises C padding (48->128), N padding
    # (380->384), M padding (60->64) and MULTIPLE N tiles (384/128 = 3),
    # i.e. the fixed out_specs index map.
    B2, M2, N2, C2 = 2, 60, 380, 48
    fA2 = jax.random.normal(jax.random.PRNGKey(1), (B2, M2, C2), dtype=jnp.float32)
    fB2 = jax.random.normal(jax.random.PRNGKey(2), (B2, N2, C2), dtype=jnp.float32)
    out2 = jax.block_until_ready(
        feature_correlation(fA2, fB2, None, None, normalization=True))
    ref2 = feature_correlation_ref(fA2, fB2, normalization=True)
    assert out2.shape == (B2, M2, N2)
    assert jnp.allclose(out2, ref2, atol=1e-4, rtol=1e-4), "tiled-N mismatch"

    print("KERNEL_OK")
</pallas_src>

<mosaic_0001>
module attributes {stable_mosaic.version = 11 : i64} {
  func.func @feature_correlation_kernel(%arg0: i32, %arg1: i32, %arg2: memref<1x64x128xf32, #tpu.memory_space<vmem>>, %arg3: memref<1x128x128xf32, #tpu.memory_space<vmem>>, %arg4: memref<1x64x128xf32, #tpu.memory_space<vmem>>) attributes {dimension_semantics = [#tpu.dimension_semantics<parallel>, #tpu.dimension_semantics<parallel>], iteration_bounds = array<i64: 2, 1>, scalar_prefetch = 0 : i64, scratch_operands = 0 : i64, tpu.core_type = #tpu.core_type<tc>, window_params = [{transform_indices = @transform_0, window_bounds = array<i64: 1, 64, 128>}, {transform_indices = @transform_1, window_bounds = array<i64: 1, 128, 128>}, {transform_indices = @transform_2, window_bounds = array<i64: 1, 64, 128>}]} {
    %c0 = arith.constant 0 : index
    %c0_0 = arith.constant 0 : index
    %c0_1 = arith.constant 0 : index
    %0 = vector.load %arg2[%c0, %c0_0, %c0_1] : memref<1x64x128xf32, #tpu.memory_space<vmem>>, vector<1x64x128xf32>
    %1 = vector.shape_cast %0 : vector<1x64x128xf32> to vector<64x128xf32>
    %c0_2 = arith.constant 0 : index
    %c0_3 = arith.constant 0 : index
    %c0_4 = arith.constant 0 : index
    %2 = vector.load %arg3[%c0_2, %c0_3, %c0_4] : memref<1x128x128xf32, #tpu.memory_space<vmem>>, vector<1x128x128xf32>
    %3 = vector.shape_cast %2 : vector<1x128x128xf32> to vector<128x128xf32>
    %cst = arith.constant dense<0.000000e+00> : vector<64x128xf32>
    %4 = tpu.matmul %1, %3, %cst {dimension_numbers = #tpu.dot_dimension_numbers<[1], [1], [0], [0], [0, 0, 1, 0], [], []>} : vector<64x128xf32>, vector<128x128xf32>, vector<64x128xf32> -> vector<64x128xf32>
    %cst_5 = arith.constant 0.000000e+00 : f32
    %5 = vector.broadcast %cst_5 : f32 to vector<64x128xf32>
    %6 = arith.maximumf %4, %5 : vector<64x128xf32>
    %7 = arith.mulf %6, %6 : vector<64x128xf32>
    %cst_6 = arith.constant dense<0.000000e+00> : vector<128xf32>
    %8 = vector.multi_reduction <add>, %7, %cst_6 [0] : vector<64x128xf32> to vector<128xf32>
    %9 = vector.shape_cast %8 : vector<128xf32> to vector<1x128xf32>
    %cst_7 = arith.constant 9.99999997E-7 : f32
    %10 = vector.broadcast %cst_7 : f32 to vector<1x128xf32>
    %11 = arith.addf %9, %10 : vector<1x128xf32>
    %12 = math.rsqrt %11 : vector<1x128xf32>
    %13 = vector.broadcast %12 : vector<1x128xf32> to vector<64x128xf32>
    %14 = arith.mulf %6, %13 : vector<64x128xf32>
    %c0_8 = arith.constant 0 : index
    %c0_9 = arith.constant 0 : index
    %c0_10 = arith.constant 0 : index
    %15 = vector.load %arg4[%c0_8, %c0_9, %c0_10] : memref<1x64x128xf32, #tpu.memory_space<vmem>>, vector<1x64x128xf32>
    %16 = vector.shape_cast %15 : vector<1x64x128xf32> to vector<64x128xf32>
    %17 = vector.shape_cast %14 : vector<64x128xf32> to vector<1x64x128xf32>
    tpu.vector_store %arg4[%c0_8, %c0_9, %c0_10], %17 {strides = array<i32>} : memref<1x64x128xf32, #tpu.memory_space<vmem>>, vector<1x64x128xf32>,
    return
  }
  func.func @transform_0(%arg0: i32, %arg1: i32) -> (i32, i32, i32) {
    %c0_i32 = arith.constant 0 : i32
    %c0_i32_0 = arith.constant 0 : i32
    %c0_i32_1 = arith.constant 0 : i32
    return %arg0, %c0_i32, %c0_i32_0 : i32, i32, i32
  }
  func.func @transform_1(%arg0: i32, %arg1: i32) -> (i32, i32, i32) {
    %c0_i32 = arith.constant 0 : i32
    %c0_i32_0 = arith.constant 0 : i32
    return %arg0, %arg1, %c0_i32 : i32, i32, i32
  }
  func.func @transform_2(%arg0: i32, %arg1: i32) -> (i32, i32, i32) {
    %c0_i32 = arith.constant 0 : i32
    %c0_i32_0 = arith.constant 0 : i32
    return %arg0, %c0_i32, %arg1 : i32, i32, i32
  }
}

</mosaic_0001>

<bundles_post_ra>
// kernel: tpu_custom_call.1
= control target key start
LH: loop header
LB: loop body
LE: loop exit
PB: predicated region body
PF: predicated region fallthrough
CT: control target
= control target key end

     0   :  { %7 = vsyncpa [#allocation3], 0  ;;  %s1165_s0 = inlined_call_operand.hbm [shape: f32[2,64,128], index: 0, kind: input, shape index: {}]   ;;  %s1166_s1 = inlined_call_operand.hbm [shape: f32[2,128,128], index: 1, kind: input, shape index: {}]   ;;  %s1167_s2 = inlined_call_operand.hbm [shape: f32[2,64,128], index: 2, kind: output, shape index: {}]  }
   0x1   :  { %9 = vsyncpa [#allocation3 + $0x1], 0 }
   0x2   :  { %10 = vsyncpa [#allocation6], 0 }
   0x3   :  { %12 = vsyncpa [#allocation6 + $0x1], 0 }
   0x4   :  { %13 = vsyncpa [#allocation4], 0 }
   0x5   :  { %15 = vsyncpa [#allocation4 + $0x1], 0  ;;  %s902_s9 = smov 0   ;;  %s904_s10 = smov 0  }
   0x6   :  { %s906_s11 = smov 0   ;;  %s908_s12 = smov 0  }
   0x7   :  { %s910_s13 = smov 0   ;;  %s912_s14 = smov 0  }
   0x8 LB: > { %s521_s15 = sadd.s32 4294967295, %s878_s14   ;;  %s522_s16 = sadd.s32 4294967294, %s878_s14   ;;  %s878_s14 = sphi %s912_s14, %s21_s14   ;;  %s874_s13 = sphi %s910_s13, %s1185_s13   ;;  %s870_s12 = sphi %s908_s12, %s1184_s12   ;;  %s866_s11 = sphi %s906_s11, %s1183_s11   ;;  %s862_s10 = sphi %s904_s10, %s1182_s10   ;;  %s858_s9 = sphi %s902_s9, %s1181_s9  }
   0x9   : > { %s33_s17 = sadd.s32 1, %s874_s13  ;;  %s40_s18 = sadd.s32 1, %s866_s11 }
   0xa   : > { %p35_p0 = scmp.ge.s32.totalorder %s33_s17, 2  ;;  %p47_p1 = scmp.ne.s32.totalorder %s866_s11, %s862_s10 }
   0xb   : > { %p48_p2 = scmp.eq.s32.totalorder %s878_s14, 0  ;;  %p53_p3 = scmp.ne.s32.totalorder %s862_s10, %s858_s9 }
   0xc   : > { %s1187_s17 = smov (%p35_p0, %s33_s17), 0  ;;  %p54_p5 = scmp.eq.s32.totalorder %s521_s15, 0 }
   0xd   : > { %p943_p4 = por %p48_p2, %p47_p1  ;;  %s37_s20 = ssub.s32 %s874_s13, %s1187_s17 }
   0xe   : > { %p107_p6 = scmp.eq.s32.totalorder %s521_s15, 1  ;;  %p38_p7 = scmp.eq.s32.totalorder %s37_s20, 0 }
   0xf   : > { %p949_p8 = por %p54_p5, %p53_p3  ;;  %p113_p10 = scmp.eq.s32.totalorder %s522_s16, 1 }
  0x10   : > { %p953_p9 = por %p107_p6, %p47_p1  ;;  %p676_p13 = scmp.lt.s32.totalorder %s878_s14, 2 }
  0x11   : > { %s1171_s21 = scalar_select %p949_p8, 1, 0 }
  0x12   : > { %s1172_s22 = scalar_select %p953_p9, 1, 0 }
  0x13   : > { %s958_s23 = scalar_select %p38_p7, %s866_s11, %s40_s18  }
  0x14   : > { %p960_p11 = por %p113_p10, %p53_p3  ;;  %s967_s25 = sand.u32 1, %s866_s11  }
  0x15   : > { %s525_s26 = sshll.u32 %s967_s25, 6  ;;  %s540_s27 = sshll.u32 %s874_s13, 10 }
  0x16   : > { %s1173_s24 = scalar_select %p960_p11, 1, 0 }
  0x17   : > { %s974_s30 = scalar_lea.hbm %s1165_s0, %s540_s27  ;;  %s137_s3 = scalar_lea.vmem [#allocation2], %s525_s26 }
  0x18   : > { %s144_s4 = sshll.u32 %s137_s3, 4  ;;  %p980_p0 = pnand %p676_p13, %p943_p4  ;;  %s976_s4 = int_to_ptr.vmem [resolvable:$true] %s144_s4 }
  0x19   : > { %s134_s6 = scalar_lea.sflag [#allocation3], %s967_s25  ;;  %s732_s7 = scalar_lea.hbm %s974_s30, 1024 }
  0x1a   : > { %p733_p2 = scmp.ne.s32.totalorder %s974_s30, %s732_s7  ;;  %p734_p3 = pneg %p980_p0 }
  0x1b   : > { %s737_s16 = scalar_lea.hbm %s1165_s0, 2048  ;;  %p738_p4 = scmp.lt.u32.totalorder %s974_s30, %s1165_s0 }
  0x1c   : > { %p735_p5 = pnand %p734_p3, %p733_p2  ;;  %p739_p7 = scmp.lt.u32.totalorder %s737_s16, %s732_s7 }
  0x1d   : > { %p741_p13 = scmp.lt.u32.totalorder %s732_s7, %s974_s30 }
  0x1e   : > { %p736_p6 = pneg %p735_p5  ;;  %p740_p10 = por %p739_p7, %p738_p4 }
  0x20   : > { %p742_p12 = por %p741_p13, %p740_p10 }
  0x22   : > { %p743_p1 = pnand %p742_p12, %p736_p6 }
  0x24   : > { %746 = shalt.err (!%p743_p1)
}
  0x25   : > { %s747_s20 = scalar_lea.vmem %s976_s4, 1024  ;;  %s880_s26 = smov [#allocation2]  }
  0x26   : > { %p748_p2 = scmp.ne.s32.totalorder %s976_s4, %s747_s20  ;;  %s752_s27 = sshll.u32 %s880_s26, 4  ;;  %s753_s27 = int_to_ptr.vmem [resolvable:$false] %s752_s27 }
  0x27   : > { %s754_s28 = scalar_lea.vmem %s753_s27, 2048  ;;  %p755_p9 = scmp.lt.s32.totalorder %s976_s4, %s753_s27 }
  0x28   : > { %p750_p5 = pnand %p748_p2, %p734_p3  ;;  %p756_p4 = scmp.lt.s32.totalorder %s754_s28, %s747_s20 }
  0x2a   : > { %p751_p11 = pneg %p750_p5  ;;  %p757_p7 = por %p756_p4, %p755_p9 }
  0x2c   : > { %p758_p10 = pnand %p757_p7, %p751_p11 }
  0x2e   : > { %761 = shalt.err (!%p758_p10)
}
  0x2f   : > { %s881_s29 = smov 128   ;;  %s882_s3 = smov 8  }
  0x30   : > { %668 = dma.hbm_to_vmem [thread:$0]  (!%p980_p0), %s974_s30, 1024, %s976_s4, %s134_s6, %s881_s29, %s881_s29, %s882_s3  }
  0x31   : > { %p175_p9 = scmp.lt.s32.totalorder %s878_s14, 3  ;;  %s528_s7 = sshll.u32 %s967_s25, 7 }
  0x32   : > { %s541_s8 = sshll.u32 %s874_s13, 11  ;;  %p1175_p11 = scmp.ge.s32.totalorder %s878_s14, 1 }
  0x33   : > { %s1028_s19 = scalar_lea.hbm %s1166_s1, %s541_s8  ;;  %s158_s20 = scalar_lea.vmem [#allocation5], %s528_s7 }
  0x34   : > { %p1021_p12 = pnand %p1175_p11, %p175_p9  ;;  %s167_s26 = sshll.u32 %s158_s20, 4  ;;  %s1030_s26 = int_to_ptr.vmem [resolvable:$true] %s167_s26 }
  0x35   : > { %s155_s30 = scalar_lea.sflag [#allocation6], %s967_s25  ;;  %s762_s4 = scalar_lea.hbm %s1028_s19, 2048 }
  0x36   : > { %p763_p1 = scmp.ne.s32.totalorder %s1028_s19, %s762_s4  ;;  %s767_s28 = scalar_lea.hbm %s1166_s1, 4096 }
  0x37   : > { %p768_p2 = scmp.lt.u32.totalorder %s1028_s19, %s1166_s1  ;;  %p769_p5 = scmp.lt.u32.totalorder %s767_s28, %s762_s4 }
  0x38   : > { %p765_p6 = pnand %p763_p1, %p734_p3  ;;  %p771_p7 = scmp.lt.u32.totalorder %s762_s4, %s1028_s19 }
  0x39   : > { %p770_p4 = por %p769_p5, %p768_p2 }
  0x3a   : > { %p766_p13 = pneg %p765_p6 }
  0x3b   : > { %p772_p10 = por %p771_p7, %p770_p4 }
  0x3d   : > { %p773_p9 = pnand %p772_p10, %p766_p13 }
  0x3f   : > { %776 = shalt.err (!%p773_p9)
}
  0x40   : > { %s777_s7 = scalar_lea.vmem %s1030_s26, 2048  ;;  %s883_s18 = smov [#allocation5]  }
  0x41   : > { %p778_p11 = scmp.ne.s32.totalorder %s1030_s26, %s777_s7  ;;  %s782_s20 = sshll.u32 %s883_s18, 4  ;;  %s783_s20 = int_to_ptr.vmem [resolvable:$false] %s782_s20 }
  0x42   : > { %s784_s6 = scalar_lea.vmem %s783_s20, 4096  ;;  %p785_p8 = scmp.lt.s32.totalorder %s1030_s26, %s783_s20 }
  0x43   : > { %p780_p1 = pnand %p778_p11, %p734_p3  ;;  %p786_p2 = scmp.lt.s32.totalorder %s784_s6, %s777_s7 }
  0x45   : > { %p781_p6 = pneg %p780_p1  ;;  %p787_p5 = por %p786_p2, %p785_p8 }
  0x47   : > { %p788_p4 = pnand %p787_p5, %p781_p6 }
  0x49   : > { %791 = shalt.err (!%p788_p4)
}
  0x4a   : > { %671 = dma.hbm_to_vmem [thread:$0]  (!%p980_p0), %s1028_s19, 2048, %s1030_s26, %s155_s30, %s881_s29, %s881_s29, %s882_s3  }
  0x4b   : > { %179 = sbr.rel (%p1021_p12) target bundleno = 431 (0x1af), region = 28  ;;  %s1064_s4 = sand.u32 (!%p1021_p12), 1, %s862_s10  }
  0x4c   : > { %s532_s27 = sshll.u32 (!%p1021_p12), %s1064_s4, 6  ;;  %s182_s5 = scalar_lea.sflag (!%p1021_p12), [#allocation3], %s1064_s4 }
  0x4d   : > { %s1070_s28 = scalar_lea.vmem (!%p1021_p12), [#allocation2], %s532_s27  ;;  %p1177_p8 = scmp.ne.s32.totalorder (!%p1021_p12), %s1171_s21, 0 }
  0x52   : > { %845 = dma.done.wait (%p1177_p8), %s182_s5, 1024  }
  0x53   : > { %847 = vsyncadd (%p1177_p8), %s182_s5, 4294966272  ;;  %s533_s25 = sshll.u32 %s1064_s4, 7  ;;  %s191_s29 = scalar_lea.sflag [#allocation6], %s1064_s4 }
  0x54   : > { %s1078_s3 = scalar_lea.vmem [#allocation5], %s533_s25 }
  0x55   : > { %849 = dma.done.wait (%p1177_p8), %s191_s29, 2048  }
  0x56   : > { %851 = vsyncadd (%p1177_p8), %s191_s29, 4294965248  ;;  %v229_v0 = vld [vmem:[%s1078_s3] sm:$0xff]  ;;  %v230_v1 = vld [vmem:[%s1078_s3 + $0x8] sm:$0xff]  ;;  %s219_s21 = scalar_lea.vmem [#allocation7], %s532_s27  ;;  %s542_s19 = sshll.u32 %s870_s12, 10 }
  0x57   : > { %v231_v2 = vld [vmem:[%s1078_s3 + $0x10] sm:$0xff]  ;;  %v611_v3 = vpack.c.bf16 %v230_v1, %v229_v0  ;;  %v232_v4 = vld [vmem:[%s1078_s3 + $0x18] sm:$0xff]  ;;  %v221_v6 = vld [vmem:[%s1070_s28] sm:$0xff]  ;;  %s412_s15 = sshll.u32 %s219_s21, 4  ;;  %s1116_s8 = scalar_lea.hbm %s1167_s2, %s542_s19  ;;  %s1111_s15 = int_to_ptr.vmem [resolvable:$true] %s412_s15 }
  0x58   : > { %v615_v5 = vpack.c.bf16 %v232_v4, %v231_v2  ;;  %v233_v7 = vld [vmem:[%s1078_s3 + $0x20] sm:$0xff]  ;;  %v234_v8 = vld [vmem:[%s1078_s3 + $0x28] sm:$0xff]  ;;  %599 = vmatprep.mubr.f32.mxu0 %v221_v6  ;;  %v235_v11 = vld [vmem:[%s1078_s3 + $0x30] sm:$0xff]  ;;  %s398_s12 = scalar_lea.sflag [#allocation4], %s1064_s4  ;;  %s792_s16 = scalar_lea.vmem %s1111_s15, 1024 }
  0x59   : > { %612 = vmatprep.subr.bf16.mxu0 %v611_v3  ;;  %643 = vmatprep.subr.bf16.mxu1 %v611_v3  ;;  %v225_v9 = vld [vmem:[%s1070_s28 + $0x20] sm:$0xff]  ;;  %v619_v10 = vpack.c.bf16 %v234_v8, %v233_v7  ;;  %v236_v12 = vld [vmem:[%s1078_s3 + $0x38] sm:$0xff]  ;;  %v238_v15 = vld [vmem:[%s1078_s3 + $0x48] sm:$0xff]  ;;  %p793_p0 = scmp.ne.s32.totalorder %s1111_s15, %s792_s16  ;;  %p1178_p3 = scmp.ne.s32.totalorder %s1172_s22, 0 }
  0x5a   : > { %614 = vmatpush3.bf16.xpose.msra.mxu0 %v611_v3  ;;  %651 = vmatpush3.bf16.xpose.msra.mxu1 %v611_v3  ;;  %v623_v13 = vpack.c.bf16 %v236_v12, %v235_v11  ;;  %v237_v14 = vld [vmem:[%s1078_s3 + $0x40] sm:$0xff]  ;;  %v239_v17 = vld [vmem:[%s1078_s3 + $0x50] sm:$0xff]  ;;  %v240_v18 = vld [vmem:[%s1078_s3 + $0x58] sm:$0xff]  ;;  %s884_s7 = smov [#allocation7]  }
  0x5b   : > { %616 = vmatprep.subr.bf16.mxu0 %v615_v5  ;;  %644 = vmatprep.subr.bf16.mxu1 %v615_v5  ;;  %v627_v16 = vpack.c.bf16 %v238_v15, %v237_v14  ;;  %v631_v19 = vpack.c.bf16 %v240_v18, %v239_v17  ;;  %v241_v20 = vld [vmem:[%s1078_s3 + $0x60] sm:$0xff]  ;;  %v242_v21 = vld [vmem:[%s1078_s3 + $0x68] sm:$0xff]  ;;  %v243_v23 = vld [vmem:[%s1078_s3 + $0x70] sm:$0xff]  ;;  %p794_p12 = pnand %p793_p0, %p1178_p3  ;;  %s796_s18 = sshll.u32 %s884_s7, 4  ;;  %s797_s18 = int_to_ptr.vmem [resolvable:$false] %s796_s18 }
  0x5c   : > { %605 = vmatprep.mubr.f32.mxu1 %v225_v9  ;;  %v635_v22 = vpack.c.bf16 %v242_v21, %v241_v20  ;;  %v244_v24 = vld [vmem:[%s1078_s3 + $0x78] sm:$0xff]  ;;  %v222_v26 = vld [vmem:[%s1070_s28 + $0x8] sm:$0xff]  ;;  %v223_v28 = vld [vmem:[%s1070_s28 + $0x10] sm:$0xff]  ;;  %s798_s20 = scalar_lea.vmem %s797_s18, 2048  ;;  %p799_p7 = scmp.lt.s32.totalorder %s1111_s15, %s797_s18 }
  0x5d   : > { %v639_v25 = vpack.c.bf16 %v244_v24, %v243_v23  ;;  %v226_v27 = vld [vmem:[%s1070_s28 + $0x28] sm:$0xff]  ;;  %v227_v29 = vld [vmem:[%s1070_s28 + $0x30] sm:$0xff]  ;;  %v224_v30 = vld [vmem:[%s1070_s28 + $0x18] sm:$0xff]  ;;  %p795_p13 = pneg %p794_p12  ;;  %p800_p10 = scmp.lt.s32.totalorder %s798_s20, %s792_s16 }
  0x5e   : > { %v228_v31 = vld [vmem:[%s1070_s28 + $0x38] sm:$0xff] }
  0x5f   : > { %p801_p9 = por %p800_p10, %p799_p7 }
  0x61   : > { %p802_p11 = pnand %p801_p9, %p795_p13 }
  0x62   : > { %618 = vmatpush3.bf16.xpose.msra.mxu0 %v615_v5  ;;  %652 = vmatpush3.bf16.xpose.msra.mxu1 %v615_v5 }
  0x63   : > { %620 = vmatprep.subr.bf16.mxu0 %v619_v10  ;;  %645 = vmatprep.subr.bf16.mxu1 %v619_v10 }
  0x6a   : > { %622 = vmatpush3.bf16.xpose.msra.mxu0 %v619_v10  ;;  %653 = vmatpush3.bf16.xpose.msra.mxu1 %v619_v10 }
  0x6b   : > { %624 = vmatprep.subr.bf16.mxu0 %v623_v13  ;;  %646 = vmatprep.subr.bf16.mxu1 %v623_v13 }
  0x72   : > { %626 = vmatpush3.bf16.xpose.msra.mxu0 %v623_v13  ;;  %654 = vmatpush3.bf16.xpose.msra.mxu1 %v623_v13 }
  0x73   : > { %628 = vmatprep.subr.bf16.mxu0 %v627_v16  ;;  %647 = vmatprep.subr.bf16.mxu1 %v627_v16 }
  0x7a   : > { %630 = vmatpush3.bf16.xpose.msra.mxu0 %v627_v16  ;;  %655 = vmatpush3.bf16.xpose.msra.mxu1 %v627_v16 }
  0x7b   : > { %632 = vmatprep.subr.bf16.mxu0 %v631_v19  ;;  %648 = vmatprep.subr.bf16.mxu1 %v631_v19 }
  0x82   : > { %634 = vmatpush3.bf16.xpose.msra.mxu0 %v631_v19  ;;  %656 = vmatpush3.bf16.xpose.msra.mxu1 %v631_v19 }
  0x83   : > { %636 = vmatprep.subr.bf16.mxu0 %v635_v22  ;;  %649 = vmatprep.subr.bf16.mxu1 %v635_v22 }
  0x8a   : > { %638 = vmatpush3.bf16.xpose.msra.mxu0 %v635_v22  ;;  %657 = vmatpush3.bf16.xpose.msra.mxu1 %v635_v22 }
  0x8b   : > { %640 = vmatprep.subr.bf16.mxu0 %v639_v25  ;;  %650 = vmatprep.subr.bf16.mxu1 %v639_v25 }
  0x92   : > { %642 = vmatpush3.bf16.xpose.msra.mxu0 %v639_v25  ;;  %658 = vmatpush3.bf16.xpose.msra.mxu1 %v639_v25 }
  0x99   : > { %600 = vmatmul.mubr.f32.vlgmr.msra.gmra.mrb[0].mxu0 %v222_v26  ;;  %606 = vmatmul.mubr.f32.vlgmr.msra.gmra.mrb[0].mxu1 %v226_v27 }
  0x9a   : > { %602 = vmatprep.mubr.f32.mxu0 %v223_v28  ;;  %608 = vmatprep.mubr.f32.mxu1 %v227_v29 }
  0x9d   : > { %603 = vmatmul.mubr.f32.gmra.mrb[2].mxu0 %v224_v30  ;;  %609 = vmatmul.mubr.f32.gmra.mrb[2].mxu1 %v228_v31 }
 0x16c   : > { %v601_v32 = vpop.f32.mrb[0].mxu0  ;;  %v607_v33 = vpop.f32.mrb[0].mxu1 }
 0x16d   : > { %v351_v34 = vmax.f32 %v601_v32, 0.0  ;;  %v311_v35 = vpop.f32.mrb[1].mxu0  ;;  %v331_v36 = vpop.f32.mrb[1].mxu1  ;;  %v355_v49 = vmax.f32 %v607_v33, 0.0 }
 0x16e   : > { %v350_v37 = vmax.f32 %v311_v35, 0.0  ;;  %v354_v47 = vmax.f32 %v331_v36, 0.0 }
 0x16f   : > { %v359_v38 = vmul.f32 %v351_v34, %v351_v34  ;;  %v363_v55 = vmul.f32 %v355_v49, %v355_v49 }
 0x170   : > { %v358_v39 = vmul.f32 %v350_v37, %v350_v37  ;;  %v604_v40 = vpop.f32.mrb[2].mxu0  ;;  %v610_v41 = vpop.f32.mrb[2].mxu1  ;;  %v362_v52 = vmul.f32 %v354_v47, %v354_v47 }
 0x171   : > { %v321_v42 = vpop.f32.mrb[3].mxu0  ;;  %v341_v43 = vpop.f32.mrb[3].mxu1  ;;  %v353_v45 = vmax.f32 %v604_v40, 0.0  ;;  %v357_v57 = vmax.f32 %v610_v41, 0.0 }
 0x172   : > { %v366_v44 = vadd.f32 %v359_v38, %v358_v39  ;;  %v352_v46 = vmax.f32 %v321_v42, 0.0  ;;  %v356_v53 = vmax.f32 %v341_v43, 0.0 }
 0x173   : > { %v361_v50 = vmul.f32 %v353_v45, %v353_v45  ;;  %v365_v60 = vmul.f32 %v357_v57, %v357_v57 }
 0x174   : > { %v360_v48 = vmul.f32 %v352_v46, %v352_v46  ;;  %v364_v58 = vmul.f32 %v356_v53, %v356_v53 }
 0x176   : > { %v367_v51 = vadd.f32 %v366_v44, %v360_v48 }
 0x178   : > { %v368_v54 = vadd.f32 %v367_v51, %v361_v50 }
 0x17a   : > { %v369_v56 = vadd.f32 %v368_v54, %v362_v52 }
 0x17c   : > { %v370_v59 = vadd.f32 %v369_v56, %v363_v55 }
 0x17e   : > { %v371_v61 = vadd.f32 %v370_v59, %v364_v58 }
 0x180   : > { %v372_v62 = vadd.f32 %v371_v61, %v365_v60 }
 0x182   : > { %v373_v63 = vrot.slane %v372_v62, 4 }
 0x184   : > { %v374_v0 = vadd.f32 %v373_v63, %v372_v62 }
 0x186   : > { %v375_v1 = vrot.slane %v374_v0, 2 }
 0x188   : > { %v376_v2 = vadd.f32 %v375_v1, %v374_v0 }
 0x18a   : > { %v377_v3 = vrot.slane %v376_v2, 1 }
 0x18c   : > { %v378_v4 = vadd.f32 %v377_v3, %v376_v2 }
 0x18e   : > { %v379_v5 = vadd.f32 1e-06, %v378_v4 }
 0x190   : > { %730 = vrsqrt.f32 %v379_v5 }
 0x19a   : > { %v731_v6 = vpop.eup %730 }
 0x19b   : > { %v381_v7 = vmul.f32 %v731_v6, %v350_v37  ;;  %v382_v8 = vmul.f32 %v731_v6, %v351_v34  ;;  %v383_v9 = vmul.f32 %v731_v6, %v352_v46  ;;  %v384_v10 = vmul.f32 %v731_v6, %v353_v45 }
 0x19c   : > { %v385_v11 = vmul.f32 %v731_v6, %v354_v47  ;;  %v386_v12 = vmul.f32 %v731_v6, %v355_v49  ;;  %v387_v13 = vmul.f32 %v731_v6, %v356_v53  ;;  %v388_v14 = vmul.f32 %v731_v6, %v357_v57 }
 0x19d   : > { %389 = vst [vmem:[%s219_s21] sm:$0xff] %v381_v7  ;;  %390 = vst [vmem:[%s219_s21 + $0x8] sm:$0xff] %v382_v8 }
 0x19e   : > { %391 = vst [vmem:[%s219_s21 + $0x10] sm:$0xff] %v383_v9  ;;  %392 = vst [vmem:[%s219_s21 + $0x18] sm:$0xff] %v384_v10 }
 0x19f   : > { %393 = vst [vmem:[%s219_s21 + $0x20] sm:$0xff] %v385_v11  ;;  %394 = vst [vmem:[%s219_s21 + $0x28] sm:$0xff] %v386_v12 }
 0x1a0   : > { %395 = vst [vmem:[%s219_s21 + $0x30] sm:$0xff] %v387_v13  ;;  %396 = vst [vmem:[%s219_s21 + $0x38] sm:$0xff] %v388_v14 }
 0x1a1   : > { %805 = shalt.err (!%p802_p11)
}
 0x1a2   : > { %s806_s6 = scalar_lea.hbm %s1116_s8, 1024  ;;  %s810_s28 = scalar_lea.hbm %s1167_s2, 2048 }
 0x1a3   : > { %p807_p1 = scmp.ne.s32.totalorder %s1116_s8, %s806_s6  ;;  %p811_p5 = scmp.lt.u32.totalorder %s1116_s8, %s1167_s2 }
 0x1a4   : > { %p812_p4 = scmp.lt.u32.totalorder %s810_s28, %s806_s6  ;;  %p814_p0 = scmp.lt.u32.totalorder %s806_s6, %s1116_s8 }
 0x1a5   : > { %p808_p6 = pnand %p807_p1, %p1178_p3 }
 0x1a6   : > { %p813_p8 = por %p812_p4, %p811_p5 }
 0x1a7   : > { %p809_p2 = pneg %p808_p6 }
 0x1a8   : > { %p815_p12 = por %p814_p0, %p813_p8 }
 0x1aa   : > { %p816_p13 = pnand %p815_p12, %p809_p2 }
 0x1ac   : > { %819 = shalt.err (!%p816_p13)
}
 0x1ad   : > { %s885_s3 = smov 128   ;;  %s886_s21 = smov 8  }
 0x1ae   : > { %663 = dma.vmem_to_hbm [thread:$0]  (%p1178_p3), %s1111_s15, 1024, %s1116_s8, %s398_s12, %s885_s3, %s885_s3, %s886_s21  }
 0x1af PF: > { %s427_s19 = sand.u32 1, %s858_s9   ;;  %p1179_p7 = scmp.ne.s32.totalorder %s1173_s24, 0 }
 0x1b0   : > { %p1180_p10 = scmp.ge.s32.totalorder %s878_s14, 2  ;;  %s428_s26 = scalar_lea.sflag [#allocation4], %s427_s19 }
 0x1b2   : > { %p673_p9 = pnand %p1180_p10, %p1179_p7 }
 0x1b4   : > { %853 = dma.done.wait (!%p673_p9), %s428_s26, 1024  }
 0x1b5   : > { %855 = vsyncadd (!%p673_p9), %s428_s26, 4294966272  ;;  %s21_s14 = sadd.s32 1, %s878_s14   ;;  %s1181_s9 = smov %s862_s10 }
 0x1b6   : > { %p18_p11 = scmp.ge.s32.totalorder %s21_s14, 4   ;;  %s1182_s10 = smov %s866_s11 }
 0x1b7   : > { %s1183_s11 = smov %s958_s23  ;;  %s1184_s12 = smov %s874_s13 }
 0x1b8   : > { %s1185_s13 = smov %s1187_s17  ;;  %20 = sbr.rel (!%p18_p11) target bundleno = 8 (0x8), region = 86 }
 0x1bf   :  { %433 = vsyncpa [#allocation3], 1 }
 0x1c0   :  { %435 = vsyncpa [#allocation3 + $0x1], 1 }
 0x1c1   :  { %436 = vsyncpa [#allocation6], 1 }
 0x1c2   :  { %438 = vsyncpa [#allocation6 + $0x1], 1 }
 0x1c3   :  { %439 = vsyncpa [#allocation4], 1 }
 0x1c4   :  { %441 = vsyncpa [#allocation4 + $0x1], 1 }

</bundles_post_ra>
